<compile_context>
chip_gen: v6e
topology: v6e:2x2x1
jax: 0.10.0
libtpu: 0.0.40
codegen_flags: <defaults>
</compile_context>

<pallas_src>
import jax
import jax.numpy as jnp
from jax.experimental import pallas as pl
from jax.experimental.pallas import tpu as pltpu


def _ceil_to(x, m):
    return -(-x // m) * m


def _pick_row_tile(rows, max_rows):
    """Choose the sublane-row tile (1 row = 128 voxels on lanes).

    Returns (ts, rows_pad) with rows_pad % ts == 0 (or ts == rows_pad for the
    tiny full-extent case)."""
    max_rows = max(8, (max_rows // 8) * 8)
    if rows <= max_rows:
        if rows >= 16:
            # Split into 2 steps so the "parallel" voxel axis can shard across
            # v7x's two TensorCores even at batch 1.
            half = _ceil_to(-(-rows // 2), 8)
            return half, 2 * half
        return rows, rows                      # single full-extent block
    return max_rows, _ceil_to(rows, max_rows)


def _make_kernel(n_folds, c_in, c_out):
    inv_folds = 1.0 / float(n_folds)  # compile-time constant: multiply, not divide

    def kernel(w_ref, b_ref, x_ref, o_ref):
        # w_ref: (n_folds*c_in*c_out,) f32 SMEM  (fold-major, then c_in, then c_out)
        # b_ref: (n_folds*c_out,)      f32 SMEM
        # x_ref: (1, c_in,  ts, 128)  VMEM block
        # o_ref: (1, c_out, ts, 128)  VMEM block
        # Load each input channel once as a dense (ts, 128) f32 slab; reuse it
        # across every fold / output channel.
        x_slabs = [x_ref[0, ci].astype(jnp.float32) for ci in range(c_in)]

        # TODO(synk): for large C_in * n_folds * C_out (e.g. C_in >= 32) add an
        # MXU path: stack folds into a (n_folds*C_out, C_in) matrix and jnp.dot.
        for co in range(c_out):
            acc = None
            for f in range(n_folds):
                logits = b_ref[f * c_out + co]                 # SMEM scalar
                for ci in range(c_in):
                    w = w_ref[(f * c_in + ci) * c_out + co]    # SMEM scalar
                    logits = logits + w * x_slabs[ci]          # VPU broadcast-FMA
                # sigmoid = 1 / (1 + exp(-x)); exp and approx reciprocal both go
                # to the otherwise-idle EUP slot; one Newton step restores full
                # f32 accuracy.  Clamp keeps exp finite for extreme logits.
                t = jnp.clip(-logits, -80.0, 80.0)
                denom = 1.0 + jnp.exp(t)
                r = pl.reciprocal(denom, approx=True)
                s = r * (2.0 - denom * r)
                acc = s if acc is None else acc + s
            # Direct per-channel lane-dense store (no sublane concatenate).
            o_ref[0, co] = (acc * inv_folds).astype(o_ref.dtype)

    return kernel


def inference_model_forward(x_ncdhw, weights, biases, *, max_rows=2048):
    """Ensemble forward: mean over folds of sigmoid(1x1x1-conv fold(x)).

    x_ncdhw: (N, C_in, D, H, W) float32 or bfloat16
    weights: (n_folds, C_in, C_out)
    biases:  (n_folds, C_out)
    returns: (N, C_out, D, H, W) float32
    max_rows: cap on the sublane-row tile (1 row = 128 voxels).  Default 2048
      rows = 262144 voxels/step (~5 MB HBM traffic at C_in=4, C_out=1 f32).
    """
    N, C_in, D, H, W = x_ncdhw.shape
    n_folds, wc_in, C_out = weights.shape
    assert wc_in == C_in
    if x_ncdhw.dtype not in (jnp.float32, jnp.bfloat16):
        x_ncdhw = x_ncdhw.astype(jnp.float32)
    x_bytes = jnp.dtype(x_ncdhw.dtype).itemsize

    DHW = D * H * W
    rows = -(-DHW // 128)  # lane-pad DHW up to a multiple of 128

    # Keep double-buffered pipeline blocks (in + out) under ~24 MiB so buffers
    # plus elementwise temporaries fit comfortably in v7x's 64 MiB VMEM.
    row_bytes = 128 * (C_in * x_bytes + C_out * 4)
    vmem_rows_cap = max(8, (((24 << 20) // (2 * row_bytes)) // 8) * 8)
    ts, rows_pad = _pick_row_tile(rows, min(max_rows, vmem_rows_cap))

    # Contiguous reshape + zero-pad only -- no HBM transpose passes.
    x3 = x_ncdhw.reshape(N, C_in, DHW)
    pad = rows_pad * 128 - DHW
    if pad:
        x3 = jnp.pad(x3, ((0, 0), (0, 0), (0, pad)))
    x4 = x3.reshape(N, C_in, rows_pad, 128)

    w_flat = weights.reshape(-1).astype(jnp.float32)
    b_flat = biases.reshape(-1).astype(jnp.float32)

    n_vox_tiles = rows_pad // ts
    kernel = _make_kernel(n_folds, C_in, C_out)

    # Scoped VMEM: double-buffered blocks + resident channel slabs / temps +
    # headroom, clamped to [32 MiB, 64 MiB] (v7x physical ceiling; v5e's 16 MiB
    # scoped default would otherwise block large tiles).
    step_bytes = ts * row_bytes
    temps_bytes = (C_in + 4) * ts * 128 * 4
    vmem_limit = 2 * step_bytes + temps_bytes + (8 << 20)
    vmem_limit = int(min(max(vmem_limit, 32 << 20), 64 << 20))

    out4 = pl.pallas_call(
        kernel,
        out_shape=jax.ShapeDtypeStruct((N, C_out, rows_pad, 128), jnp.float32),
        grid_spec=pltpu.PrefetchScalarGridSpec(
            num_scalar_prefetch=0,
            grid=(N, n_vox_tiles),
            in_specs=[
                pl.BlockSpec(memory_space=pltpu.MemorySpace.SMEM),   # weights (flat)
                pl.BlockSpec(memory_space=pltpu.MemorySpace.SMEM),   # biases  (flat)
                pl.BlockSpec((1, C_in, ts, 128), lambda n, j: (n, 0, j, 0)),
            ],
            out_specs=pl.BlockSpec((1, C_out, ts, 128), lambda n, j: (n, 0, j, 0)),
        ),
        compiler_params=pltpu.CompilerParams(
            dimension_semantics=("parallel", "parallel"),
            vmem_limit_bytes=vmem_limit,
        ),
    )(w_flat, b_flat, x4)

    out = out4.reshape(N, C_out, rows_pad * 128)[:, :, :DHW]
    return out.reshape(N, C_out, D, H, W)


def _reference(x_ncdhw, weights, biases):
    # Pure-JAX reference of the PyTorch forward.
    n_folds = weights.shape[0]
    res = 0.0
    for f in range(n_folds):
        logits = (
            jnp.einsum("ncdhw,co->nodhw", x_ncdhw.astype(jnp.float32), weights[f])
            + biases[f][None, :, None, None, None]
        )
        res = res + jax.nn.sigmoid(logits)
    return res / n_folds


if __name__ == "__main__":
    # batch=2, C_in=4, 3 folds, 1 class; spatial 10x12x12 -> DHW=1440 (not a
    # multiple of 128) exercises lane padding; max_rows=8 exercises the
    # multi-tile voxel grid (12 rows -> padded to 16 -> 2 voxel steps).
    N, C_in, D, H, W = 2, 4, 10, 12, 12
    n_folds, C_out = 3, 1

    key = jax.random.PRNGKey(0)
    kx, kw, kb = jax.random.split(key, 3)
    x = jax.random.normal(kx, (N, C_in, D, H, W), dtype=jnp.float32)
    weights = 0.1 * jax.random.normal(kw, (n_folds, C_in, C_out), dtype=jnp.float32)
    biases = 0.1 * jax.random.normal(kb, (n_folds, C_out), dtype=jnp.float32)

    ref = _reference(x, weights, biases)

    # Multi-tile + padded path.
    out_small = jax.block_until_ready(
        inference_model_forward(x, weights, biases, max_rows=8))
    assert out_small.shape == (N, C_out, D, H, W)
    assert jnp.allclose(out_small, ref, atol=2e-5, rtol=2e-5)

    # Default (large-tile) path: single full-extent voxel block at this size.
    out_big = jax.block_until_ready(inference_model_forward(x, weights, biases))
    assert out_big.shape == (N, C_out, D, H, W)
    assert jnp.allclose(out_big, ref, atol=2e-5, rtol=2e-5)

    print("KERNEL_OK")
</pallas_src>

<mosaic_0001>
module attributes {stable_mosaic.version = 11 : i64} {
  func.func @kernel(%arg0: i32, %arg1: i32, %arg2: memref<12xf32, #tpu.memory_space<smem>>, %arg3: memref<3xf32, #tpu.memory_space<smem>>, %arg4: memref<1x4x8x128xf32, #tpu.memory_space<vmem>>, %arg5: memref<1x1x8x128xf32, #tpu.memory_space<vmem>>) attributes {dimension_semantics = [#tpu.dimension_semantics<parallel>, #tpu.dimension_semantics<parallel>], iteration_bounds = array<i64: 2, 2>, scalar_prefetch = 0 : i64, scratch_operands = 0 : i64, tpu.core_type = #tpu.core_type<tc>, window_params = [{transform_indices = @transform_0, window_bounds = array<i64: 12>}, {transform_indices = @transform_1, window_bounds = array<i64: 3>}, {transform_indices = @transform_2, window_bounds = array<i64: 1, 4, 8, 128>}, {transform_indices = @transform_3, window_bounds = array<i64: 1, 1, 8, 128>}]} {
    %c0 = arith.constant 0 : index
    %c0_0 = arith.constant 0 : index
    %c0_1 = arith.constant 0 : index
    %c0_2 = arith.constant 0 : index
    %0 = vector.load %arg4[%c0, %c0_0, %c0_1, %c0_2] : memref<1x4x8x128xf32, #tpu.memory_space<vmem>>, vector<1x1x8x128xf32>
    %1 = vector.shape_cast %0 : vector<1x1x8x128xf32> to vector<8x128xf32>
    %c0_3 = arith.constant 0 : index
    %c1 = arith.constant 1 : index
    %c0_4 = arith.constant 0 : index
    %c0_5 = arith.constant 0 : index
    %2 = vector.load %arg4[%c0_3, %c1, %c0_4, %c0_5] : memref<1x4x8x128xf32, #tpu.memory_space<vmem>>, vector<1x1x8x128xf32>
    %3 = vector.shape_cast %2 : vector<1x1x8x128xf32> to vector<8x128xf32>
    %c0_6 = arith.constant 0 : index
    %c2 = arith.constant 2 : index
    %c0_7 = arith.constant 0 : index
    %c0_8 = arith.constant 0 : index
    %4 = vector.load %arg4[%c0_6, %c2, %c0_7, %c0_8] : memref<1x4x8x128xf32, #tpu.memory_space<vmem>>, vector<1x1x8x128xf32>
    %5 = vector.shape_cast %4 : vector<1x1x8x128xf32> to vector<8x128xf32>
    %c0_9 = arith.constant 0 : index
    %c3 = arith.constant 3 : index
    %c0_10 = arith.constant 0 : index
    %c0_11 = arith.constant 0 : index
    %6 = vector.load %arg4[%c0_9, %c3, %c0_10, %c0_11] : memref<1x4x8x128xf32, #tpu.memory_space<vmem>>, vector<1x1x8x128xf32>
    %7 = vector.shape_cast %6 : vector<1x1x8x128xf32> to vector<8x128xf32>
    %c0_12 = arith.constant 0 : index
    %8 = memref.load %arg3[%c0_12] : memref<3xf32, #tpu.memory_space<smem>>
    %c0_13 = arith.constant 0 : index
    %9 = memref.load %arg2[%c0_13] : memref<12xf32, #tpu.memory_space<smem>>
    %10 = vector.broadcast %9 : f32 to vector<8x128xf32>
    %11 = arith.mulf %10, %1 : vector<8x128xf32>
    %12 = vector.broadcast %8 : f32 to vector<8x128xf32>
    %13 = arith.addf %12, %11 : vector<8x128xf32>
    %c1_14 = arith.constant 1 : index
    %14 = memref.load %arg2[%c1_14] : memref<12xf32, #tpu.memory_space<smem>>
    %15 = vector.broadcast %14 : f32 to vector<8x128xf32>
    %16 = arith.mulf %15, %3 : vector<8x128xf32>
    %17 = arith.addf %13, %16 : vector<8x128xf32>
    %c2_15 = arith.constant 2 : index
    %18 = memref.load %arg2[%c2_15] : memref<12xf32, #tpu.memory_space<smem>>
    %19 = vector.broadcast %18 : f32 to vector<8x128xf32>
    %20 = arith.mulf %19, %5 : vector<8x128xf32>
    %21 = arith.addf %17, %20 : vector<8x128xf32>
    %c3_16 = arith.constant 3 : index
    %22 = memref.load %arg2[%c3_16] : memref<12xf32, #tpu.memory_space<smem>>
    %23 = vector.broadcast %22 : f32 to vector<8x128xf32>
    %24 = arith.mulf %23, %7 : vector<8x128xf32>
    %25 = arith.addf %21, %24 : vector<8x128xf32>
    %cst = arith.constant 0.000000e+00 : f32
    %26 = vector.broadcast %cst : f32 to vector<8x128xf32>
    %27 = arith.subf %26, %25 : vector<8x128xf32>
    %cst_17 = arith.constant -8.000000e+01 : f32
    %cst_18 = arith.constant 8.000000e+01 : f32
    %28 = vector.broadcast %cst_17 : f32 to vector<8x128xf32>
    %29 = arith.maximumf %28, %27 : vector<8x128xf32>
    %30 = vector.broadcast %cst_18 : f32 to vector<8x128xf32>
    %31 = arith.minimumf %30, %29 : vector<8x128xf32>
    %32 = math.exp %31 : vector<8x128xf32>
    %cst_19 = arith.constant 1.000000e+00 : f32
    %33 = vector.broadcast %cst_19 : f32 to vector<8x128xf32>
    %34 = arith.addf %33, %32 : vector<8x128xf32>
    %35 = tpu.reciprocal %34 {approx = true} : vector<8x128xf32> -> vector<8x128xf32>
    %36 = arith.mulf %34, %35 : vector<8x128xf32>
    %cst_20 = arith.constant 2.000000e+00 : f32
    %37 = vector.broadcast %cst_20 : f32 to vector<8x128xf32>
    %38 = arith.subf %37, %36 : vector<8x128xf32>
    %39 = arith.mulf %35, %38 : vector<8x128xf32>
    %c1_21 = arith.constant 1 : index
    %40 = memref.load %arg3[%c1_21] : memref<3xf32, #tpu.memory_space<smem>>
    %c4 = arith.constant 4 : index
    %41 = memref.load %arg2[%c4] : memref<12xf32, #tpu.memory_space<smem>>
    %42 = vector.broadcast %41 : f32 to vector<8x128xf32>
    %43 = arith.mulf %42, %1 : vector<8x128xf32>
    %44 = vector.broadcast %40 : f32 to vector<8x128xf32>
    %45 = arith.addf %44, %43 : vector<8x128xf32>
    %c5 = arith.constant 5 : index
    %46 = memref.load %arg2[%c5] : memref<12xf32, #tpu.memory_space<smem>>
    %47 = vector.broadcast %46 : f32 to vector<8x128xf32>
    %48 = arith.mulf %47, %3 : vector<8x128xf32>
    %49 = arith.addf %45, %48 : vector<8x128xf32>
    %c6 = arith.constant 6 : index
    %50 = memref.load %arg2[%c6] : memref<12xf32, #tpu.memory_space<smem>>
    %51 = vector.broadcast %50 : f32 to vector<8x128xf32>
    %52 = arith.mulf %51, %5 : vector<8x128xf32>
    %53 = arith.addf %49, %52 : vector<8x128xf32>
    %c7 = arith.constant 7 : index
    %54 = memref.load %arg2[%c7] : memref<12xf32, #tpu.memory_space<smem>>
    %55 = vector.broadcast %54 : f32 to vector<8x128xf32>
    %56 = arith.mulf %55, %7 : vector<8x128xf32>
    %57 = arith.addf %53, %56 : vector<8x128xf32>
    %cst_22 = arith.constant 0.000000e+00 : f32
    %58 = vector.broadcast %cst_22 : f32 to vector<8x128xf32>
    %59 = arith.subf %58, %57 : vector<8x128xf32>
    %cst_23 = arith.constant -8.000000e+01 : f32
    %cst_24 = arith.constant 8.000000e+01 : f32
    %60 = vector.broadcast %cst_23 : f32 to vector<8x128xf32>
    %61 = arith.maximumf %60, %59 : vector<8x128xf32>
    %62 = vector.broadcast %cst_24 : f32 to vector<8x128xf32>
    %63 = arith.minimumf %62, %61 : vector<8x128xf32>
    %64 = math.exp %63 : vector<8x128xf32>
    %cst_25 = arith.constant 1.000000e+00 : f32
    %65 = vector.broadcast %cst_25 : f32 to vector<8x128xf32>
    %66 = arith.addf %65, %64 : vector<8x128xf32>
    %67 = tpu.reciprocal %66 {approx = true} : vector<8x128xf32> -> vector<8x128xf32>
    %68 = arith.mulf %66, %67 : vector<8x128xf32>
    %cst_26 = arith.constant 2.000000e+00 : f32
    %69 = vector.broadcast %cst_26 : f32 to vector<8x128xf32>
    %70 = arith.subf %69, %68 : vector<8x128xf32>
    %71 = arith.mulf %67, %70 : vector<8x128xf32>
    %72 = arith.addf %39, %71 : vector<8x128xf32>
    %c2_27 = arith.constant 2 : index
    %73 = memref.load %arg3[%c2_27] : memref<3xf32, #tpu.memory_space<smem>>
    %c8 = arith.constant 8 : index
    %74 = memref.load %arg2[%c8] : memref<12xf32, #tpu.memory_space<smem>>
    %75 = vector.broadcast %74 : f32 to vector<8x128xf32>
    %76 = arith.mulf %75, %1 : vector<8x128xf32>
    %77 = vector.broadcast %73 : f32 to vector<8x128xf32>
    %78 = arith.addf %77, %76 : vector<8x128xf32>
    %c9 = arith.constant 9 : index
    %79 = memref.load %arg2[%c9] : memref<12xf32, #tpu.memory_space<smem>>
    %80 = vector.broadcast %79 : f32 to vector<8x128xf32>
    %81 = arith.mulf %80, %3 : vector<8x128xf32>
    %82 = arith.addf %78, %81 : vector<8x128xf32>
    %c10 = arith.constant 10 : index
    %83 = memref.load %arg2[%c10] : memref<12xf32, #tpu.memory_space<smem>>
    %84 = vector.broadcast %83 : f32 to vector<8x128xf32>
    %85 = arith.mulf %84, %5 : vector<8x128xf32>
    %86 = arith.addf %82, %85 : vector<8x128xf32>
    %c11 = arith.constant 11 : index
    %87 = memref.load %arg2[%c11] : memref<12xf32, #tpu.memory_space<smem>>
    %88 = vector.broadcast %87 : f32 to vector<8x128xf32>
    %89 = arith.mulf %88, %7 : vector<8x128xf32>
    %90 = arith.addf %86, %89 : vector<8x128xf32>
    %cst_28 = arith.constant 0.000000e+00 : f32
    %91 = vector.broadcast %cst_28 : f32 to vector<8x128xf32>
    %92 = arith.subf %91, %90 : vector<8x128xf32>
    %cst_29 = arith.constant -8.000000e+01 : f32
    %cst_30 = arith.constant 8.000000e+01 : f32
    %93 = vector.broadcast %cst_29 : f32 to vector<8x128xf32>
    %94 = arith.maximumf %93, %92 : vector<8x128xf32>
    %95 = vector.broadcast %cst_30 : f32 to vector<8x128xf32>
    %96 = arith.minimumf %95, %94 : vector<8x128xf32>
    %97 = math.exp %96 : vector<8x128xf32>
    %cst_31 = arith.constant 1.000000e+00 : f32
    %98 = vector.broadcast %cst_31 : f32 to vector<8x128xf32>
    %99 = arith.addf %98, %97 : vector<8x128xf32>
    %100 = tpu.reciprocal %99 {approx = true} : vector<8x128xf32> -> vector<8x128xf32>
    %101 = arith.mulf %99, %100 : vector<8x128xf32>
    %cst_32 = arith.constant 2.000000e+00 : f32
    %102 = vector.broadcast %cst_32 : f32 to vector<8x128xf32>
    %103 = arith.subf %102, %101 : vector<8x128xf32>
    %104 = arith.mulf %100, %103 : vector<8x128xf32>
    %105 = arith.addf %72, %104 : vector<8x128xf32>
    %cst_33 = arith.constant 0.333333343 : f32
    %106 = vector.broadcast %cst_33 : f32 to vector<8x128xf32>
    %107 = arith.mulf %105, %106 : vector<8x128xf32>
    %c0_34 = arith.constant 0 : index
    %c0_35 = arith.constant 0 : index
    %c0_36 = arith.constant 0 : index
    %c0_37 = arith.constant 0 : index
    %108 = vector.load %arg5[%c0_34, %c0_35, %c0_36, %c0_37] : memref<1x1x8x128xf32, #tpu.memory_space<vmem>>, vector<1x1x8x128xf32>
    %109 = vector.shape_cast %108 : vector<1x1x8x128xf32> to vector<8x128xf32>
    %110 = vector.shape_cast %107 : vector<8x128xf32> to vector<1x1x8x128xf32>
    tpu.vector_store %arg5[%c0_34, %c0_35, %c0_36, %c0_37], %110 {strides = array<i32>} : memref<1x1x8x128xf32, #tpu.memory_space<vmem>>, vector<1x1x8x128xf32>,
    return
  }
  func.func @transform_0(%arg0: i32, %arg1: i32) -> i32 {
    %c0_i32 = arith.constant 0 : i32
    %c0_i32_0 = arith.constant 0 : i32
    return %c0_i32 : i32
  }
  func.func @transform_1(%arg0: i32, %arg1: i32) -> i32 {
    %c0_i32 = arith.constant 0 : i32
    %c0_i32_0 = arith.constant 0 : i32
    return %c0_i32 : i32
  }
  func.func @transform_2(%arg0: i32, %arg1: i32) -> (i32, i32, i32, i32) {
    %c0_i32 = arith.constant 0 : i32
    %c0_i32_0 = arith.constant 0 : i32
    %c0_i32_1 = arith.constant 0 : i32
    return %arg0, %c0_i32, %arg1, %c0_i32_0 : i32, i32, i32, i32
  }
  func.func @transform_3(%arg0: i32, %arg1: i32) -> (i32, i32, i32, i32) {
    %c0_i32 = arith.constant 0 : i32
    %c0_i32_0 = arith.constant 0 : i32
    %c0_i32_1 = arith.constant 0 : i32
    return %arg0, %c0_i32, %arg1, %c0_i32_0 : i32, i32, i32, i32
  }
}

</mosaic_0001>

<bundles_post_ra>
// kernel: tpu_custom_call.1
= control target key start
LH: loop header
LB: loop body
LE: loop exit
PB: predicated region body
PF: predicated region fallthrough
CT: control target
= control target key end

     0   :  { %s988_s0 = inlined_call_operand.hbm [shape: f32[12], index: 0, kind: input, shape index: {}]   ;;  %s989_s1 = inlined_call_operand.vmem [shape: f32[3], index: 1, kind: input, shape index: {}]   ;;  %s990_s2 = inlined_call_operand.hbm [shape: f32[2,4,16,128], index: 2, kind: input, shape index: {}]   ;;  %s991_s3 = inlined_call_operand.hbm [shape: f32[2,1,16,128], index: 3, kind: output, shape index: {}]  }
   0x1   :  { %995 = sst [smem:[#allocation17_spill]] %s988_s0 }
   0x2   :  { %996 = sst [smem:[#allocation18_spill]] %s989_s1 }
   0x3   :  { %8 = vsyncpa [#allocation5], 0 }
   0x4   :  { %9 = vsyncpa [#allocation6], 0 }
   0x5   :  { %10 = vsyncpa [#allocation3], 0 }
   0x6   :  { %12 = vsyncpa [#allocation3 + $0x1], 0 }
   0x7   :  { %13 = vsyncpa [#allocation4], 0 }
   0x8   :  { %15 = vsyncpa [#allocation4 + $0x1], 0  ;;  %s790_s12 = smov 0   ;;  %s792_s13 = smov 0  }
   0x9   :  { %s794_s14 = smov 0   ;;  %s796_s15 = smov 0  }
   0xa   :  { %s798_s16 = smov 0   ;;  %s800_s17 = smov 0  }
   0xb   :  { %s802_s18 = smov 0   ;;  %s804_s19 = smov 0  }
   0xc LB: > { %997 = sst [smem:[#allocation14_spill]] %s733_s12  ;;  %s451_s20 = sadd.s32 4294967295, %s761_s19   ;;  %s761_s19 = sphi %s804_s19, %s21_s19   ;;  %s757_s18 = sphi %s802_s18, %s1021_s18   ;;  %s753_s17 = sphi %s800_s17, %s1020_s17   ;;  %s749_s16 = sphi %s798_s16, %s1019_s16   ;;  %s745_s15 = sphi %s796_s15, %s1018_s15   ;;  %s741_s14 = sphi %s794_s14, %s1017_s14   ;;  %s737_s13 = sphi %s792_s13, %s1016_s13   ;;  %s733_s12 = sphi %s790_s12, %s1015_s12  }
   0xd   : > { %s452_s21 = sadd.s32 4294967294, %s761_s19   ;;  %p91_p0 = scmp.ne.s32.totalorder %s741_s14, %s737_s13 }
   0xe   : > { %p92_p1 = scmp.eq.s32.totalorder %s761_s19, 0  ;;  %p97_p2 = scmp.ne.s32.totalorder %s737_s13, %s733_s12 }
   0xf   : > { %p838_p3 = scmp.eq.s32.totalorder %s451_s20, 0  ;;  %p123_p4 = scmp.eq.s32.totalorder %s451_s20, 3 }
  0x10   : > { %p93_p5 = por %p92_p1, %p91_p0  ;;  %p129_p6 = scmp.eq.s32.totalorder %s452_s21, 3 }
  0x11   : > { %p844_p7 = por %p838_p3, %p97_p2  ;;  %p848_p8 = por %p123_p4, %p91_p0 }
  0x12   : > { %p852_p9 = por %p129_p6, %p97_p2  ;;  %p453_p10 = scmp.ge.s32.totalorder %s761_s19, 1 }
  0x13   : > { %p136_p11 = scmp.lt.s32.totalorder %s761_s19, 5  ;;  %p518_p13 = scmp.lt.s32.totalorder %s761_s19, 4 }
  0x14   : > { %s1001_s26 = scalar_select %p852_p9, 1, 0 }
  0x15   : > { %p858_p12 = pnand %p453_p10, %p136_p11  ;;  %s1004_s1 = sld [smem:[#allocation18_spill]] }
  0x16   : > { %1002 = sst [smem:[#allocation15_spill]] %s1001_s26  ;;  %p868_p1 = pnand %p518_p13, %p93_p5 }
  0x17   : > { %p501_p0 = pneg %p858_p12  ;;  %s763_s6 = smov [#allocation2]  }
  0x18   : > { %s1007_s0 = sld [smem:[#allocation17_spill]] }
  0x19   : > { %p874_p2 = pnand %p501_p0, %p838_p3 }
  0x1b   : > { %s158_s30 = sshll.u32 %s1004_s1, 4  ;;  %p616_p5 = pneg %p874_p2  ;;  %s159_s30 = int_to_ptr.vmem [resolvable:$true] %s158_s30 }
  0x1c   : > { %s614_s9 = scalar_lea.vmem %s159_s30, 16  ;;  %p622_p11 = scmp.lt.s32.totalorder %s159_s30, %s159_s30 }
  0x1d   : > { %p615_p4 = scmp.ne.s32.totalorder %s159_s30, %s614_s9  ;;  %p623_p13 = scmp.lt.s32.totalorder %s614_s9, %s614_s9 }
  0x1e   : > { %504 = dma.hbm_to_smem (!%p874_p2), %s1007_s0, 16, %s763_s6, [#allocation5]  }
  0x1f   : > { %p617_p6 = pnand %p616_p5, %p615_p4  ;;  %p624_p0 = por %p623_p13, %p622_p11 }
  0x21   : > { %p618_p10 = pneg %p617_p6 }
  0x23   : > { %p625_p9 = pnand %p624_p0, %p618_p10 }
  0x25   : > { %628 = shalt.err (!%p625_p9)
}
  0x26   : > { %s764_s10 = smov [#allocation7]   ;;  %s30_s11 = sadd.s32 1, %s753_s17 }
  0x27   : > { %507 = dma.vmem_to_smem (!%p874_p2), %s159_s30, 16, %s764_s10, [#allocation6]  }
  0x28   : > { %s33_s20 = sadd.s32 1, %s757_s18  ;;  %p31_p4 = scmp.ge.s32.totalorder %s30_s11, 2 }
  0x29   : > { %s169_s21 = sand.u32 1, %s741_s14   ;;  %s458_s5 = sshll.u32 %s757_s18, 3 }
  0x2a   : > { %s457_s28 = sshll.u32 %s169_s21, 5  ;;  %s1023_s11 = smov (%p31_p4, %s30_s11), 0 }
  0x2b   : > { %1008 = sst [smem:[#allocation16_spill]] %s1023_s11  ;;  %s1025_s20 = smov (!%p31_p4, %s33_s20), %s757_s18 }
  0x2c   : > { %s80_s29 = ssub.s32 %s753_s17, %s1023_s11  ;;  %p35_p9 = scmp.ge.s32.totalorder %s1025_s20, 2 }
  0x2d   : > { %s178_s6 = sadd.s32 %s753_s17, %s458_s5  ;;  %s173_s7 = scalar_lea.vmem [#allocation8], %s457_s28 }
  0x2e   : > { %s181_s8 = sshll.u32 %s173_s7, 4  ;;  %s1027_s20 = smov (%p35_p9, %s1025_s20), 0  ;;  %s182_s8 = int_to_ptr.vmem [resolvable:$true] %s181_s8 }
  0x2f   : > { %s459_s30 = sshll.u32 %s178_s6, 7  ;;  %s79_s9 = ssub.s32 %s757_s18, %s1027_s20 }
  0x30   : > { %s180_s0 = scalar_lea.hbm %s990_s2, %s459_s30  ;;  %s81_s1 = sor.u32 %s80_s29, %s79_s9 }
  0x31   : > { %p82_p2 = scmp.eq.s32.totalorder %s81_s1, 0  ;;  %s1009_s26 = sadd.s32 1, %s741_s14 }
  0x32   : > { %s170_s11 = scalar_lea.sflag [#allocation3], %s169_s21  ;;  %p631_p5 = pneg %p868_p1 }
  0x33   : > { %s907_s12 = scalar_select %p82_p2, %s741_s14, %s1009_s26  }
  0x34   : > { %s642_s28 = scalar_lea.vmem %s182_s8, 512  ;;  %s765_s5 = smov [#allocation8]  }
  0x35   : > { %p643_p6 = scmp.ne.s32.totalorder %s182_s8, %s642_s28  ;;  %s647_s6 = sshll.u32 %s765_s5, 4  ;;  %s648_s6 = int_to_ptr.vmem [resolvable:$false] %s647_s6 }
  0x36   : > { %s649_s7 = scalar_lea.vmem %s648_s6, 1024  ;;  %p650_p13 = scmp.lt.s32.totalorder %s182_s8, %s648_s6 }
  0x37   : > { %p645_p10 = pnand %p643_p6, %p631_p5  ;;  %p651_p0 = scmp.lt.s32.totalorder %s649_s7, %s642_s28 }
  0x39   : > { %p646_p11 = pneg %p645_p10  ;;  %p652_p4 = por %p651_p0, %p650_p13 }
  0x3b   : > { %p653_p9 = pnand %p652_p4, %p646_p11 }
  0x3d   : > { %656 = shalt.err (!%p653_p9)
}
  0x3e   : > { %s766_s1 = smov 256   ;;  %s767_s22 = smov 128  }
  0x3f   : > { %s768_s26 = smov 8   ;;  %193 = sbr.rel (%p858_p12) target bundleno = 164 (0xa4), region = 32 }
  0x40   : > { %511 = dma.hbm_to_vmem [thread:$0]  (!%p868_p1), %s180_s0, 512, %s182_s8, %s170_s11, %s766_s1, %s767_s22, %s768_s26  }
  0x44   : > { %716 = dma.done.wait (%p838_p3), [#allocation5], 16  }
  0x45   : > { %718 = vsyncadd (%p838_p3), [#allocation5], 4294967280 }
  0x46   : > { %720 = dma.done.wait (%p838_p3), [#allocation6], 16  }
  0x47   : > { %722 = vsyncadd (%p838_p3), [#allocation6], 4294967280  ;;  %s924_s21 = sand.u32 1, %s737_s13  }
  0x48   : > { %s463_s0 = sshll.u32 %s924_s21, 5  ;;  %s204_s27 = scalar_lea.sflag [#allocation3], %s924_s21 }
  0x49   : > { %s207_s4 = scalar_lea.vmem [#allocation8], %s463_s0 }
  0x4a   : > { %724 = dma.done.wait (%p844_p7), %s204_s27, 512  }
  0x4b   : > { %726 = vsyncadd (%p844_p7), %s204_s27, 4294966784 }
  0x4c   : > { %212 = sfence }
  0x4d   : > { %s238_s11 = sld [smem:[#allocation7]]  ;;  %v231_v0 = vld [vmem:[%s207_s4] sm:$0xff]  ;;  %v465_v1 = vld [vmem:[%s207_s4 + $0x8] sm:$0xff]  ;;  %v466_v2 = vld [vmem:[%s207_s4 + $0x10] sm:$0xff]  ;;  %s464_s0 = sshll.u32 %s924_s21, 3 }
  0x4e   : > { %s239_s29 = sld [smem:[#allocation2]]  ;;  %v467_v7 = vld [vmem:[%s207_s4 + $0x18] sm:$0xff]  ;;  %s485_s27 = sshll.u32 %s749_s16, 1 }
  0x4f   : > { %s468_s8 = sld [smem:[#allocation2 + $0x1]]  ;;  %s338_s4 = sadd.s32 %s745_s15, %s485_s27 }
  0x50   : > { %s469_s23 = sld [smem:[#allocation2 + $0x2]]  ;;  %s769_s15 = smov [#allocation9]  }
  0x51   : > { %s470_s30 = sld [smem:[#allocation2 + $0x3]] }
  0x52   : > { %s932_s9 = sld [smem:[#allocation7 + $0x1]] }
  0x53   : > { %s473_s10 = sld [smem:[#allocation2 + $0x4]]  ;;  %v242_v4 = vstv %s238_s11  ;;  %s230_s11 = scalar_lea.vmem [#allocation9], %s464_s0 }
  0x54   : > { %v240_v3 = vstv %s239_s29  ;;  %s474_s28 = sld [smem:[#allocation2 + $0x5]]  ;;  %s342_s29 = sshll.u32 %s230_s11, 4  ;;  %s938_s29 = int_to_ptr.vmem [resolvable:$true] %s342_s29 }
  0x55   : > { %v241_v5 = vmul.f32 %v240_v3, %v231_v0  ;;  %v245_v6 = vstv %s468_s8  ;;  %s475_s24 = sld [smem:[#allocation2 + $0x6]]  ;;  %s486_s8 = sshll.u32 %s338_s4, 7 }
  0x56   : > { %v246_v8 = vmul.f32 %v465_v1, %v245_v6  ;;  %v249_v9 = vstv %s469_s23  ;;  %s476_s5 = sld [smem:[#allocation2 + $0x7]]  ;;  %s340_s16 = scalar_lea.hbm %s991_s3, %s486_s8 }
  0x57   : > { %v243_v10 = vadd.f32 %v242_v4, %v241_v5  ;;  %v250_v11 = vmul.f32 %v466_v2, %v249_v9  ;;  %v253_v12 = vstv %s470_s30  ;;  %s478_s6 = sld [smem:[#allocation7 + $0x2]] }
  0x58   : > { %s479_s7 = sld [smem:[#allocation2 + $0x8]]  ;;  %v254_v14 = vmul.f32 %v467_v7, %v253_v12  ;;  %v270_v16 = vstv %s932_s9  ;;  %s327_s9 = scalar_lea.sflag [#allocation4], %s924_s21 }
  0x59   : > { %v247_v13 = vadd.f32 %v246_v8, %v243_v10  ;;  %v268_v15 = vstv %s473_s10  ;;  %s480_s1 = sld [smem:[#allocation2 + $0x9]]  ;;  %s657_s10 = scalar_lea.vmem %s938_s29, 128 }
  0x5a   : > { %v269_v17 = vmul.f32 %v268_v15, %v231_v0  ;;  %v273_v18 = vstv %s474_s28  ;;  %s481_s22 = sld [smem:[#allocation2 + $0xa]]  ;;  %p658_p3 = scmp.ne.s32.totalorder %s938_s29, %s657_s10 }
  0x5b   : > { %v251_v19 = vadd.f32 %v250_v11, %v247_v13  ;;  %v274_v20 = vmul.f32 %v465_v1, %v273_v18  ;;  %v277_v21 = vstv %s475_s24  ;;  %s482_s26 = sld [smem:[#allocation2 + $0xb]]  ;;  %s661_s28 = sshll.u32 %s769_s15, 4  ;;  %s662_s28 = int_to_ptr.vmem [resolvable:$false] %s661_s28 }
  0x5c   : > { %v271_v22 = vadd.f32 %v270_v16, %v269_v17  ;;  %v278_v23 = vmul.f32 %v466_v2, %v277_v21  ;;  %v281_v24 = vstv %s476_s5  ;;  %p659_p7 = pnand %p658_p3, %p848_p8  ;;  %s663_s24 = scalar_lea.vmem %s662_s28, 256 }
  0x5d   : > { %v255_v25 = vadd.f32 %v254_v14, %v251_v19  ;;  %v282_v27 = vmul.f32 %v467_v7, %v281_v24  ;;  %v299_v29 = vstv %s478_s6  ;;  %p664_p1 = scmp.lt.s32.totalorder %s938_s29, %s662_s28  ;;  %p665_p2 = scmp.lt.s32.totalorder %s663_s24, %s657_s10 }
  0x5e   : > { %v275_v26 = vadd.f32 %v274_v20, %v271_v22  ;;  %v297_v28 = vstv %s479_s7  ;;  %p660_p12 = pneg %p659_p7 }
  0x5f   : > { %v256_v30 = vsub.f32 0.0, %v255_v25  ;;  %v298_v31 = vmul.f32 %v297_v28, %v231_v0  ;;  %v302_v32 = vstv %s480_s1  ;;  %p666_p5 = por %p665_p2, %p664_p1 }
  0x60   : > { %v279_v33 = vadd.f32 %v278_v23, %v275_v26  ;;  %v303_v34 = vmul.f32 %v465_v1, %v302_v32  ;;  %v306_v35 = vstv %s481_s22 }
  0x61   : > { %v471_v36 = vclamps-f32 %v256_v30, 80.0  ;;  %v300_v37 = vadd.f32 %v299_v29, %v298_v31  ;;  %v307_v38 = vmul.f32 %v466_v2, %v306_v35  ;;  %v310_v39 = vstv %s482_s26  ;;  %p667_p6 = pnand %p666_p5, %p660_p12 }
  0x62   : > { %v283_v40 = vadd.f32 %v282_v27, %v279_v33  ;;  %v311_v43 = vmul.f32 %v467_v7, %v310_v39 }
  0x63   : > { %v259_v41 = vmul.f32 1.442695, %v471_v36  ;;  %v304_v42 = vadd.f32 %v303_v34, %v300_v37 }
  0x64   : > { %v284_v44 = vsub.f32 0.0, %v283_v40 }
  0x65   : > { %591 = vpow2.f32 %v259_v41  ;;  %v308_v45 = vadd.f32 %v307_v38, %v304_v42 }
  0x66   : > { %v477_v46 = vclamps-f32 %v284_v44, 80.0 }
  0x67   : > { %v312_v47 = vadd.f32 %v311_v43, %v308_v45 }
  0x68   : > { %v287_v48 = vmul.f32 1.442695, %v477_v46 }
  0x69   : > { %v313_v49 = vsub.f32 0.0, %v312_v47 }
  0x6a   : > { %593 = vpow2.f32 %v287_v48 }
  0x6b   : > { %v483_v50 = vclamps-f32 %v313_v49, 80.0 }
  0x6d   : > { %v316_v51 = vmul.f32 1.442695, %v483_v50 }
  0x6f   : > { %595 = vpow2.f32 %v316_v51 }
  0x72   : > { %v592_v52 = vpop.eup %591 }
  0x73   : > { %v261_v53 = vadd.f32 1.0, %v592_v52 }
  0x75   : > { %597 = vrcp.f32 %v261_v53 }
  0x77   : > { %v594_v54 = vpop.eup %593 }
  0x78   : > { %v289_v55 = vadd.f32 1.0, %v594_v54 }
  0x7a   : > { %599 = vrcp.f32 %v289_v55 }
  0x7c   : > { %v596_v56 = vpop.eup %595 }
  0x7d   : > { %v318_v57 = vadd.f32 1.0, %v596_v56 }
  0x7f   : > { %601 = vrcp.f32 %v318_v57 }
  0x82   : > { %v598_v58 = vpop.eup %597 }
  0x83   : > { %v263_v59 = vmul.f32 %v598_v58, %v261_v53 }
  0x85   : > { %v264_v61 = vsub.f32 2.0, %v263_v59 }
  0x87   : > { %v600_v60 = vpop.eup %599  ;;  %v265_v0 = vmul.f32 %v598_v58, %v264_v61 }
  0x88   : > { %v291_v62 = vmul.f32 %v600_v60, %v289_v55 }
  0x8a   : > { %v292_v63 = vsub.f32 2.0, %v291_v62 }
  0x8c   : > { %v602_v1 = vpop.eup %601  ;;  %v293_v2 = vmul.f32 %v600_v60, %v292_v63 }
  0x8d   : > { %v320_v3 = vmul.f32 %v602_v1, %v318_v57 }
  0x8e   : > { %v294_v4 = vadd.f32 %v293_v2, %v265_v0 }
  0x8f   : > { %v321_v5 = vsub.f32 2.0, %v320_v3 }
  0x91   : > { %v322_v6 = vmul.f32 %v602_v1, %v321_v5 }
  0x93   : > { %v323_v7 = vadd.f32 %v322_v6, %v294_v4 }
  0x95   : > { %v324_v8 = vmul.f32 0.33333334, %v323_v7 }
  0x97   : > { %325 = vst [vmem:[%s230_s11] sm:$0xff] %v324_v8 }
  0x98   : > { %670 = shalt.err (!%p667_p6)
}
  0x99   : > { %s671_s5 = scalar_lea.hbm %s340_s16, 128  ;;  %s675_s7 = scalar_lea.hbm %s991_s3, 512 }
  0x9a   : > { %p672_p10 = scmp.ne.s32.totalorder %s340_s16, %s671_s5  ;;  %p676_p0 = scmp.lt.s32.totalorder %s340_s16, %s991_s3 }
  0x9b   : > { %p677_p4 = scmp.lt.s32.totalorder %s675_s7, %s671_s5 }
  0x9c   : > { %p673_p11 = pnand %p672_p10, %p848_p8 }
  0x9d   : > { %p678_p9 = por %p677_p4, %p676_p0 }
  0x9e   : > { %p674_p13 = pneg %p673_p11 }
  0xa0   : > { %p679_p3 = pnand %p678_p9, %p674_p13 }
  0xa2   : > { %682 = shalt.err (!%p679_p3)
}
  0xa3   : > { %499 = dma.vmem_to_hbm [thread:$0]  (%p848_p8), %s938_s29, 128, %s340_s16, %s327_s9  }
  0xa4 PF: > { %s1010_s26 = sld [smem:[#allocation14_spill]]  ;;  %p521_p7 = scmp.ge.s32.totalorder %s761_s19, 2 }
  0xa5   : > { %s1011_s0 = sld [smem:[#allocation15_spill]] }
  0xaa   : > { %s354_s27 = sand.u32 1, %s1010_s26  }
  0xab   : > { %p1012_p12 = scmp.ne.s32.totalorder %s1011_s0, 0  ;;  %s355_s4 = scalar_lea.sflag [#allocation4], %s354_s27 }
  0xad   : > { %p513_p1 = pnand %p521_p7, %p1012_p12 }
  0xaf   : > { %p514_p2 = pneg %p513_p1 }
  0xb1   : > { %728 = dma.done.wait (%p514_p2), %s355_s4, 128  }
  0xb2   : > { %730 = vsyncadd (%p514_p2), %s355_s4, 4294967168  ;;  %s21_s19 = sadd.s32 1, %s761_s19   ;;  %s1013_s25 = smov %s907_s12 }
  0xb3   : > { %p18_p5 = scmp.ge.s32.totalorder %s21_s19, 6   ;;  %s1014_s11 = sld [smem:[#allocation16_spill]] }
  0xb4   : > { %s1015_s12 = smov %s737_s13  ;;  %s1016_s13 = smov %s741_s14 }
  0xb5   : > { %s1017_s14 = smov %s1013_s25  ;;  %s1018_s15 = smov %s753_s17 }
  0xb6   : > { %s1019_s16 = smov %s757_s18  ;;  %s1021_s18 = smov %s1027_s20 }
  0xb7   :  { %20 = sbr.rel (!%p18_p5) target bundleno = 12 (0xc), region = 90 }
  0xb9   : > { %s1020_s17 = smov %s1014_s11 }
  0xbc   :  { %360 = vsyncpa [#allocation3], 1 }
  0xbd   :  { %362 = vsyncpa [#allocation3 + $0x1], 1 }
  0xbe   :  { %363 = vsyncpa [#allocation4], 1 }
  0xbf   :  { %365 = vsyncpa [#allocation4 + $0x1], 1 }
  0xc0   :  { %366 = vsyncpa [#allocation5], 1 }
  0xc1   :  { %368 = vsyncpa [#allocation5 + $0x1], 1 }
  0xc2   :  { %369 = vsyncpa [#allocation6], 1 }
  0xc3   :  { %371 = vsyncpa [#allocation6 + $0x1], 1 }

</bundles_post_ra>
